<compile_context>
chip_gen: v5e
topology: v5e:2x2
jax: 0.10.0
libtpu: 0.0.40
codegen_flags: <defaults>
</compile_context>

<pallas_src>
import functools

import jax
import jax.numpy as jnp
import numpy as np
from jax import lax
from jax.experimental import pallas as pl
from jax.experimental.pallas import tpu as pltpu


def _residual_block_kernel(x_ref, w1_ref, b1_ref, w2_ref, b2_ref, mask_ref,
                           o_ref, stk_ref, *, shifts):
    # x_ref   : (1, C, L)   L = Nb * Mp (Nb images' pixels on the lane axis)
    # w*_ref  : (C, kk*C)   column t*C+ci holds W_torch[co, ci, kh, kw], t = kh*k+kw
    # b*_ref  : (C, 1)
    # mask_ref: (kk*C, L)   0/1 tap-validity mask (also kills cross-image wrap)
    # o_ref   : (1, C, L)
    # stk_ref : (kk*C, L)   VMEM scratch holding the stacked tap operand
    C = x_ref.shape[1]
    L = x_ref.shape[2]
    x = x_ref[0]                       # (C, L) f32
    mask = mask_ref[...]               # (kk*C, L)

    def conv(xin, w_ref, b_ref):
        # Build the stacked (kk*C, L) tap operand: one XLU roll per tap,
        # then a single VPU mask multiply over the whole stack.
        for t, d in enumerate(shifts):
            xs = xin if d == 0 else pltpu.roll(xin, shift=(-d) % L, axis=1)
            stk_ref[pl.ds(t * C, C), :] = xs
        stacked = stk_ref[...] * mask
        # One MXU matmul per conv; bias add is the epilogue.
        return jnp.dot(w_ref[...], stacked,
                       preferred_element_type=jnp.float32) + b_ref[...]

    h = conv(x, w1_ref, b1_ref)
    h = jnp.where(h >= 0, h, 0.2 * h)          # leaky_relu(0.2)
    h = conv(h, w2_ref, b2_ref)
    y = x + h                                  # residual
    y = jnp.where(y >= 0, y, 0.2 * y)          # leaky_relu(0.2)
    o_ref[0] = y.astype(o_ref.dtype)


@functools.lru_cache(maxsize=None)
def _tap_mask(H, W, Mp, Nb, C, ksize):
    """(kk*C, Nb*Mp) 0/1 tap-validity mask, built once per shape configuration."""
    pad = ksize // 2
    M = H * W
    m = np.arange(Mp)
    hh, ww = m // W, m % W
    in_img = m < M
    rows = []
    for dh in range(-pad, pad + 1):
        for dw in range(-pad, pad + 1):
            rows.append(in_img & (hh + dh >= 0) & (hh + dh < H)
                        & (ww + dw >= 0) & (ww + dw < W))
    mask = np.stack(rows, 0).astype(np.float32)   # (kk, Mp)
    mask = np.tile(mask, (1, Nb))                 # (kk, Nb*Mp) image-major lanes
    mask = np.repeat(mask, C, axis=0)             # (kk*C, Nb*Mp)
    return jnp.asarray(mask)


def pack_params(w1, b1, w2, b2):
    """Repack PyTorch-layout Conv2d params into kernel layout. Call ONCE."""
    C, _, k, _ = w1.shape

    def pack_w(w):  # (C_out, C_in, kh, kw) -> (C_out, k*k*C_in), col = t*C_in + ci
        return jnp.transpose(w, (0, 2, 3, 1)).reshape(C, k * k * C)

    return pack_w(w1), b1.reshape(C, 1), pack_w(w2), b2.reshape(C, 1)


def residual_block_forward(x, w1_packed, b1_col, w2_packed, b2_col, *,
                           kernel_size=3, batch_fold=None):
    """x: (N, C, H, W); packed params from pack_params(). Matches the PyTorch module."""
    N, C, H, W = x.shape
    k = kernel_size
    kk = k * k
    M = H * W
    Mp = ((M + 127) // 128) * 128          # lane-dense guardrail (multiple of 128)

    if batch_fold is None:
        # Fold batch into lanes to amortize per-step overhead, but keep >= 2
        # grid steps when N >= 2 so v7x megacore can use both TensorCores.
        batch_fold = max(1, N // 2)
    Nb = batch_fold
    G = -(-N // Nb)                        # number of grid steps
    Np = G * Nb
    L = Nb * Mp

    x_flat = x.reshape(N, C, M)
    if Np != N or Mp != M:
        x_flat = jnp.pad(x_flat, ((0, Np - N), (0, 0), (0, Mp - M)))
    # Fold Nb images onto the lane axis: (Np, C, Mp) -> (G, C, Nb*Mp).
    x_fold = x_flat.reshape(G, Nb, C, Mp).transpose(0, 2, 1, 3).reshape(G, C, L)

    mask = _tap_mask(H, W, Mp, Nb, C, k)
    pad = k // 2
    shifts = tuple(dh * W + dw
                   for dh in range(-pad, pad + 1)
                   for dw in range(-pad, pad + 1))

    kernel = functools.partial(_residual_block_kernel, shifts=shifts)

    out = pl.pallas_call(
        kernel,
        out_shape=jax.ShapeDtypeStruct((G, C, L), x.dtype),
        grid_spec=pltpu.PrefetchScalarGridSpec(
            num_scalar_prefetch=0,
            grid=(G,),
            in_specs=[
                pl.BlockSpec((1, C, L), lambda g: (g, 0, 0)),      # folded x
                pl.BlockSpec((C, kk * C), lambda g: (0, 0)),       # w1 (resident)
                pl.BlockSpec((C, 1), lambda g: (0, 0)),            # b1
                pl.BlockSpec((C, kk * C), lambda g: (0, 0)),       # w2
                pl.BlockSpec((C, 1), lambda g: (0, 0)),            # b2
                pl.BlockSpec((kk * C, L), lambda g: (0, 0)),       # tap masks
            ],
            out_specs=pl.BlockSpec((1, C, L), lambda g: (g, 0, 0)),
            scratch_shapes=[pltpu.VMEM((kk * C, L), jnp.float32)],
        ),
        compiler_params=pltpu.CompilerParams(
            dimension_semantics=("parallel",)),
    )(x_fold, w1_packed, b1_col, w2_packed, b2_col, mask)

    # Unfold lanes back to (N, C, H, W) and drop any padding.
    out = out.reshape(G, C, Nb, Mp).transpose(0, 2, 1, 3).reshape(Np, C, Mp)
    return out[:N, :, :M].reshape(N, C, H, W)


def residual_block_reference(x, w1, b1, w2, b2, kernel_size=3):
    pad = kernel_size // 2

    def conv(z, w, b):
        return lax.conv_general_dilated(
            z, w, window_strides=(1, 1), padding=((pad, pad), (pad, pad)),
            dimension_numbers=("NCHW", "OIHW", "NCHW"),
        ) + b.reshape(1, -1, 1, 1)

    h = conv(x, w1, b1)
    h = jnp.where(h >= 0, h, 0.2 * h)
    h = conv(h, w2, b2)
    y = x + h
    return jnp.where(y >= 0, y, 0.2 * y)


if __name__ == "__main__":
    key = jax.random.PRNGKey(0)
    k_x, k_w1, k_b1, k_w2, k_b2, k_x4 = jax.random.split(key, 6)

    N, C, H, W = 2, 4, 16, 16
    ksize = 3
    fan_in = C * ksize * ksize

    x = jax.random.normal(k_x, (N, C, H, W), dtype=jnp.float32)
    w1 = jax.random.normal(k_w1, (C, C, ksize, ksize), dtype=jnp.float32) / jnp.sqrt(fan_in)
    b1 = jax.random.normal(k_b1, (C,), dtype=jnp.float32) * 0.01
    w2 = jax.random.normal(k_w2, (C, C, ksize, ksize), dtype=jnp.float32) / jnp.sqrt(fan_in)
    b2 = jax.random.normal(k_b2, (C,), dtype=jnp.float32) * 0.01

    packed = pack_params(w1, b1, w2, b2)          # hoisted: done once, not per call

    out = residual_block_forward(x, *packed, kernel_size=ksize)
    out = jax.block_until_ready(out)
    ref = residual_block_reference(x, w1, b1, w2, b2, ksize)
    assert out.shape == (N, C, H, W), out.shape
    err = float(jnp.max(jnp.abs(out - ref)))
    assert jnp.allclose(out, ref, atol=1e-4, rtol=1e-4), err

    # Also exercise the batch-lane-folding path (Nb=2 -> 2 grid steps x 2 images).
    x4 = jax.random.normal(k_x4, (4, C, H, W), dtype=jnp.float32)
    out4 = jax.block_until_ready(
        residual_block_forward(x4, *packed, kernel_size=ksize, batch_fold=2))
    ref4 = residual_block_reference(x4, w1, b1, w2, b2, ksize)
    err4 = float(jnp.max(jnp.abs(out4 - ref4)))
    assert jnp.allclose(out4, ref4, atol=1e-4, rtol=1e-4), err4

    print("KERNEL_OK")
</pallas_src>

<mosaic_0001>
module attributes {stable_mosaic.version = 11 : i64} {
  func.func @_residual_block_kernel(%arg0: i32, %arg1: memref<1x4x256xf32, #tpu.memory_space<vmem>>, %arg2: memref<4x36xf32, #tpu.memory_space<vmem>>, %arg3: memref<4x1xf32, #tpu.memory_space<vmem>>, %arg4: memref<4x36xf32, #tpu.memory_space<vmem>>, %arg5: memref<4x1xf32, #tpu.memory_space<vmem>>, %arg6: memref<36x256xf32, #tpu.memory_space<vmem>>, %arg7: memref<1x4x256xf32, #tpu.memory_space<vmem>>, %arg8: memref<36x256xf32, #tpu.memory_space<vmem>>) attributes {dimension_semantics = [#tpu.dimension_semantics<parallel>], iteration_bounds = array<i64: 2>, scalar_prefetch = 0 : i64, scratch_operands = 1 : i64, tpu.core_type = #tpu.core_type<tc>, window_params = [{transform_indices = @transform_0, window_bounds = array<i64: 1, 4, 256>}, {pipeline_mode = #tpu.pipeline_mode<synchronous>, transform_indices = @transform_1, window_bounds = array<i64: 4, 36>}, {pipeline_mode = #tpu.pipeline_mode<synchronous>, transform_indices = @transform_2, window_bounds = array<i64: 4, 1>}, {pipeline_mode = #tpu.pipeline_mode<synchronous>, transform_indices = @transform_3, window_bounds = array<i64: 4, 36>}, {pipeline_mode = #tpu.pipeline_mode<synchronous>, transform_indices = @transform_4, window_bounds = array<i64: 4, 1>}, {pipeline_mode = #tpu.pipeline_mode<synchronous>, transform_indices = @transform_5, window_bounds = array<i64: 36, 256>}, {transform_indices = @transform_6, window_bounds = array<i64: 1, 4, 256>}]} {
    %c0 = arith.constant 0 : index
    %c0_0 = arith.constant 0 : index
    %c0_1 = arith.constant 0 : index
    %0 = vector.load %arg1[%c0, %c0_0, %c0_1] : memref<1x4x256xf32, #tpu.memory_space<vmem>>, vector<1x4x256xf32>
    %1 = vector.shape_cast %0 : vector<1x4x256xf32> to vector<4x256xf32>
    %c0_2 = arith.constant 0 : index
    %c0_3 = arith.constant 0 : index
    %2 = vector.load %arg6[%c0_2, %c0_3] : memref<36x256xf32, #tpu.memory_space<vmem>>, vector<36x256xf32>
    %c17_i32 = arith.constant 17 : i32
    %3 = tpu.dynamic_rotate %1 by %c17_i32 dim 1 : vector<4x256xf32>, i32 -> vector<4x256xf32>
    %c0_4 = arith.constant 0 : index
    %c0_5 = arith.constant 0 : index
    %4 = vector.load %arg8[%c0_4, %c0_5] : memref<36x256xf32, #tpu.memory_space<vmem>>, vector<4x256xf32>
    tpu.vector_store %arg8[%c0_4, %c0_5], %3 {strides = array<i32>} : memref<36x256xf32, #tpu.memory_space<vmem>>, vector<4x256xf32>,
    %c16_i32 = arith.constant 16 : i32
    %5 = tpu.dynamic_rotate %1 by %c16_i32 dim 1 : vector<4x256xf32>, i32 -> vector<4x256xf32>
    %c4 = arith.constant 4 : index
    %c0_6 = arith.constant 0 : index
    %6 = vector.load %arg8[%c4, %c0_6] : memref<36x256xf32, #tpu.memory_space<vmem>>, vector<4x256xf32>
    tpu.vector_store %arg8[%c4, %c0_6], %5 {strides = array<i32>} : memref<36x256xf32, #tpu.memory_space<vmem>>, vector<4x256xf32>,
    %c15_i32 = arith.constant 15 : i32
    %7 = tpu.dynamic_rotate %1 by %c15_i32 dim 1 : vector<4x256xf32>, i32 -> vector<4x256xf32>
    %c8 = arith.constant 8 : index
    %c0_7 = arith.constant 0 : index
    %8 = vector.load %arg8[%c8, %c0_7] : memref<36x256xf32, #tpu.memory_space<vmem>>, vector<4x256xf32>
    tpu.vector_store %arg8[%c8, %c0_7], %7 {strides = array<i32>} : memref<36x256xf32, #tpu.memory_space<vmem>>, vector<4x256xf32>,
    %c1_i32 = arith.constant 1 : i32
    %9 = tpu.dynamic_rotate %1 by %c1_i32 dim 1 : vector<4x256xf32>, i32 -> vector<4x256xf32>
    %c12 = arith.constant 12 : index
    %c0_8 = arith.constant 0 : index
    %10 = vector.load %arg8[%c12, %c0_8] : memref<36x256xf32, #tpu.memory_space<vmem>>, vector<4x256xf32>
    tpu.vector_store %arg8[%c12, %c0_8], %9 {strides = array<i32>} : memref<36x256xf32, #tpu.memory_space<vmem>>, vector<4x256xf32>,
    %c16 = arith.constant 16 : index
    %c0_9 = arith.constant 0 : index
    %11 = vector.load %arg8[%c16, %c0_9] : memref<36x256xf32, #tpu.memory_space<vmem>>, vector<4x256xf32>
    tpu.vector_store %arg8[%c16, %c0_9], %1 {strides = array<i32>} : memref<36x256xf32, #tpu.memory_space<vmem>>, vector<4x256xf32>,
    %c255_i32 = arith.constant 255 : i32
    %12 = tpu.dynamic_rotate %1 by %c255_i32 dim 1 : vector<4x256xf32>, i32 -> vector<4x256xf32>
    %c20 = arith.constant 20 : index
    %c0_10 = arith.constant 0 : index
    %13 = vector.load %arg8[%c20, %c0_10] : memref<36x256xf32, #tpu.memory_space<vmem>>, vector<4x256xf32>
    tpu.vector_store %arg8[%c20, %c0_10], %12 {strides = array<i32>} : memref<36x256xf32, #tpu.memory_space<vmem>>, vector<4x256xf32>,
    %c241_i32 = arith.constant 241 : i32
    %14 = tpu.dynamic_rotate %1 by %c241_i32 dim 1 : vector<4x256xf32>, i32 -> vector<4x256xf32>
    %c24 = arith.constant 24 : index
    %c0_11 = arith.constant 0 : index
    %15 = vector.load %arg8[%c24, %c0_11] : memref<36x256xf32, #tpu.memory_space<vmem>>, vector<4x256xf32>
    tpu.vector_store %arg8[%c24, %c0_11], %14 {strides = array<i32>} : memref<36x256xf32, #tpu.memory_space<vmem>>, vector<4x256xf32>,
    %c240_i32 = arith.constant 240 : i32
    %16 = tpu.dynamic_rotate %1 by %c240_i32 dim 1 : vector<4x256xf32>, i32 -> vector<4x256xf32>
    %c28 = arith.constant 28 : index
    %c0_12 = arith.constant 0 : index
    %17 = vector.load %arg8[%c28, %c0_12] : memref<36x256xf32, #tpu.memory_space<vmem>>, vector<4x256xf32>
    tpu.vector_store %arg8[%c28, %c0_12], %16 {strides = array<i32>} : memref<36x256xf32, #tpu.memory_space<vmem>>, vector<4x256xf32>,
    %c239_i32 = arith.constant 239 : i32
    %18 = tpu.dynamic_rotate %1 by %c239_i32 dim 1 : vector<4x256xf32>, i32 -> vector<4x256xf32>
    %c32 = arith.constant 32 : index
    %c0_13 = arith.constant 0 : index
    %19 = vector.load %arg8[%c32, %c0_13] : memref<36x256xf32, #tpu.memory_space<vmem>>, vector<4x256xf32>
    tpu.vector_store %arg8[%c32, %c0_13], %18 {strides = array<i32>} : memref<36x256xf32, #tpu.memory_space<vmem>>, vector<4x256xf32>,
    %c0_14 = arith.constant 0 : index
    %c0_15 = arith.constant 0 : index
    %20 = vector.load %arg8[%c0_14, %c0_15] : memref<36x256xf32, #tpu.memory_space<vmem>>, vector<36x256xf32>
    %21 = arith.mulf %20, %2 : vector<36x256xf32>
    %c0_16 = arith.constant 0 : index
    %c0_17 = arith.constant 0 : index
    %22 = vector.load %arg2[%c0_16, %c0_17] : memref<4x36xf32, #tpu.memory_space<vmem>>, vector<4x36xf32>
    %cst = arith.constant dense<0.000000e+00> : vector<4x256xf32>
    %23 = tpu.matmul %22, %21, %cst {dimension_numbers = #tpu.dot_dimension_numbers<[1], [0], [0], [1], [0, 0, 1, 1], [], []>} : vector<4x36xf32>, vector<36x256xf32>, vector<4x256xf32> -> vector<4x256xf32>
    %c0_18 = arith.constant 0 : index
    %c0_19 = arith.constant 0 : index
    %24 = vector.load %arg3[%c0_18, %c0_19] : memref<4x1xf32, #tpu.memory_space<vmem>>, vector<4x1xf32>
    %25 = vector.broadcast %24 : vector<4x1xf32> to vector<4x256xf32>
    %26 = arith.addf %23, %25 : vector<4x256xf32>
    %cst_20 = arith.constant 0.000000e+00 : f32
    %27 = vector.broadcast %cst_20 : f32 to vector<4x256xf32>
    %28 = arith.cmpf oge, %26, %27 : vector<4x256xf32>
    %cst_21 = arith.constant 2.000000e-01 : f32
    %29 = vector.broadcast %cst_21 : f32 to vector<4x256xf32>
    %30 = arith.mulf %29, %26 : vector<4x256xf32>
    %31 = arith.select %28, %26, %30 : vector<4x256xi1>, vector<4x256xf32>
    %c17_i32_22 = arith.constant 17 : i32
    %32 = tpu.dynamic_rotate %31 by %c17_i32_22 dim 1 : vector<4x256xf32>, i32 -> vector<4x256xf32>
    %c0_23 = arith.constant 0 : index
    %c0_24 = arith.constant 0 : index
    %33 = vector.load %arg8[%c0_23, %c0_24] : memref<36x256xf32, #tpu.memory_space<vmem>>, vector<4x256xf32>
    tpu.vector_store %arg8[%c0_23, %c0_24], %32 {strides = array<i32>} : memref<36x256xf32, #tpu.memory_space<vmem>>, vector<4x256xf32>,
    %c16_i32_25 = arith.constant 16 : i32
    %34 = tpu.dynamic_rotate %31 by %c16_i32_25 dim 1 : vector<4x256xf32>, i32 -> vector<4x256xf32>
    %c4_26 = arith.constant 4 : index
    %c0_27 = arith.constant 0 : index
    %35 = vector.load %arg8[%c4_26, %c0_27] : memref<36x256xf32, #tpu.memory_space<vmem>>, vector<4x256xf32>
    tpu.vector_store %arg8[%c4_26, %c0_27], %34 {strides = array<i32>} : memref<36x256xf32, #tpu.memory_space<vmem>>, vector<4x256xf32>,
    %c15_i32_28 = arith.constant 15 : i32
    %36 = tpu.dynamic_rotate %31 by %c15_i32_28 dim 1 : vector<4x256xf32>, i32 -> vector<4x256xf32>
    %c8_29 = arith.constant 8 : index
    %c0_30 = arith.constant 0 : index
    %37 = vector.load %arg8[%c8_29, %c0_30] : memref<36x256xf32, #tpu.memory_space<vmem>>, vector<4x256xf32>
    tpu.vector_store %arg8[%c8_29, %c0_30], %36 {strides = array<i32>} : memref<36x256xf32, #tpu.memory_space<vmem>>, vector<4x256xf32>,
    %c1_i32_31 = arith.constant 1 : i32
    %38 = tpu.dynamic_rotate %31 by %c1_i32_31 dim 1 : vector<4x256xf32>, i32 -> vector<4x256xf32>
    %c12_32 = arith.constant 12 : index
    %c0_33 = arith.constant 0 : index
    %39 = vector.load %arg8[%c12_32, %c0_33] : memref<36x256xf32, #tpu.memory_space<vmem>>, vector<4x256xf32>
    tpu.vector_store %arg8[%c12_32, %c0_33], %38 {strides = array<i32>} : memref<36x256xf32, #tpu.memory_space<vmem>>, vector<4x256xf32>,
    %c16_34 = arith.constant 16 : index
    %c0_35 = arith.constant 0 : index
    %40 = vector.load %arg8[%c16_34, %c0_35] : memref<36x256xf32, #tpu.memory_space<vmem>>, vector<4x256xf32>
    tpu.vector_store %arg8[%c16_34, %c0_35], %31 {strides = array<i32>} : memref<36x256xf32, #tpu.memory_space<vmem>>, vector<4x256xf32>,
    %c255_i32_36 = arith.constant 255 : i32
    %41 = tpu.dynamic_rotate %31 by %c255_i32_36 dim 1 : vector<4x256xf32>, i32 -> vector<4x256xf32>
    %c20_37 = arith.constant 20 : index
    %c0_38 = arith.constant 0 : index
    %42 = vector.load %arg8[%c20_37, %c0_38] : memref<36x256xf32, #tpu.memory_space<vmem>>, vector<4x256xf32>
    tpu.vector_store %arg8[%c20_37, %c0_38], %41 {strides = array<i32>} : memref<36x256xf32, #tpu.memory_space<vmem>>, vector<4x256xf32>,
    %c241_i32_39 = arith.constant 241 : i32
    %43 = tpu.dynamic_rotate %31 by %c241_i32_39 dim 1 : vector<4x256xf32>, i32 -> vector<4x256xf32>
    %c24_40 = arith.constant 24 : index
    %c0_41 = arith.constant 0 : index
    %44 = vector.load %arg8[%c24_40, %c0_41] : memref<36x256xf32, #tpu.memory_space<vmem>>, vector<4x256xf32>
    tpu.vector_store %arg8[%c24_40, %c0_41], %43 {strides = array<i32>} : memref<36x256xf32, #tpu.memory_space<vmem>>, vector<4x256xf32>,
    %c240_i32_42 = arith.constant 240 : i32
    %45 = tpu.dynamic_rotate %31 by %c240_i32_42 dim 1 : vector<4x256xf32>, i32 -> vector<4x256xf32>
    %c28_43 = arith.constant 28 : index
    %c0_44 = arith.constant 0 : index
    %46 = vector.load %arg8[%c28_43, %c0_44] : memref<36x256xf32, #tpu.memory_space<vmem>>, vector<4x256xf32>
    tpu.vector_store %arg8[%c28_43, %c0_44], %45 {strides = array<i32>} : memref<36x256xf32, #tpu.memory_space<vmem>>, vector<4x256xf32>,
    %c239_i32_45 = arith.constant 239 : i32
    %47 = tpu.dynamic_rotate %31 by %c239_i32_45 dim 1 : vector<4x256xf32>, i32 -> vector<4x256xf32>
    %c32_46 = arith.constant 32 : index
    %c0_47 = arith.constant 0 : index
    %48 = vector.load %arg8[%c32_46, %c0_47] : memref<36x256xf32, #tpu.memory_space<vmem>>, vector<4x256xf32>
    tpu.vector_store %arg8[%c32_46, %c0_47], %47 {strides = array<i32>} : memref<36x256xf32, #tpu.memory_space<vmem>>, vector<4x256xf32>,
    %c0_48 = arith.constant 0 : index
    %c0_49 = arith.constant 0 : index
    %49 = vector.load %arg8[%c0_48, %c0_49] : memref<36x256xf32, #tpu.memory_space<vmem>>, vector<36x256xf32>
    %50 = arith.mulf %49, %2 : vector<36x256xf32>
    %c0_50 = arith.constant 0 : index
    %c0_51 = arith.constant 0 : index
    %51 = vector.load %arg4[%c0_50, %c0_51] : memref<4x36xf32, #tpu.memory_space<vmem>>, vector<4x36xf32>
    %cst_52 = arith.constant dense<0.000000e+00> : vector<4x256xf32>
    %52 = tpu.matmul %51, %50, %cst_52 {dimension_numbers = #tpu.dot_dimension_numbers<[1], [0], [0], [1], [0, 0, 1, 1], [], []>} : vector<4x36xf32>, vector<36x256xf32>, vector<4x256xf32> -> vector<4x256xf32>
    %c0_53 = arith.constant 0 : index
    %c0_54 = arith.constant 0 : index
    %53 = vector.load %arg5[%c0_53, %c0_54] : memref<4x1xf32, #tpu.memory_space<vmem>>, vector<4x1xf32>
    %54 = vector.broadcast %53 : vector<4x1xf32> to vector<4x256xf32>
    %55 = arith.addf %52, %54 : vector<4x256xf32>
    %56 = arith.addf %1, %55 : vector<4x256xf32>
    %cst_55 = arith.constant 0.000000e+00 : f32
    %57 = vector.broadcast %cst_55 : f32 to vector<4x256xf32>
    %58 = arith.cmpf oge, %56, %57 : vector<4x256xf32>
    %cst_56 = arith.constant 2.000000e-01 : f32
    %59 = vector.broadcast %cst_56 : f32 to vector<4x256xf32>
    %60 = arith.mulf %59, %56 : vector<4x256xf32>
    %61 = arith.select %58, %56, %60 : vector<4x256xi1>, vector<4x256xf32>
    %c0_57 = arith.constant 0 : index
    %c0_58 = arith.constant 0 : index
    %c0_59 = arith.constant 0 : index
    %62 = vector.load %arg7[%c0_57, %c0_58, %c0_59] : memref<1x4x256xf32, #tpu.memory_space<vmem>>, vector<1x4x256xf32>
    %63 = vector.shape_cast %62 : vector<1x4x256xf32> to vector<4x256xf32>
    %64 = vector.shape_cast %61 : vector<4x256xf32> to vector<1x4x256xf32>
    tpu.vector_store %arg7[%c0_57, %c0_58, %c0_59], %64 {strides = array<i32>} : memref<1x4x256xf32, #tpu.memory_space<vmem>>, vector<1x4x256xf32>,
    return
  }
  func.func @transform_0(%arg0: i32) -> (i32, i32, i32) {
    %c0_i32 = arith.constant 0 : i32
    %c0_i32_0 = arith.constant 0 : i32
    %c0_i32_1 = arith.constant 0 : i32
    return %arg0, %c0_i32, %c0_i32_0 : i32, i32, i32
  }
  func.func @transform_1(%arg0: i32) -> (i32, i32) {
    %c0_i32 = arith.constant 0 : i32
    %c0_i32_0 = arith.constant 0 : i32
    %c0_i32_1 = arith.constant 0 : i32
    return %c0_i32, %c0_i32_0 : i32, i32
  }
  func.func @transform_2(%arg0: i32) -> (i32, i32) {
    %c0_i32 = arith.constant 0 : i32
    %c0_i32_0 = arith.constant 0 : i32
    %c0_i32_1 = arith.constant 0 : i32
    return %c0_i32, %c0_i32_0 : i32, i32
  }
  func.func @transform_3(%arg0: i32) -> (i32, i32) {
    %c0_i32 = arith.constant 0 : i32
    %c0_i32_0 = arith.constant 0 : i32
    %c0_i32_1 = arith.constant 0 : i32
    return %c0_i32, %c0_i32_0 : i32, i32
  }
  func.func @transform_4(%arg0: i32) -> (i32, i32) {
    %c0_i32 = arith.constant 0 : i32
    %c0_i32_0 = arith.constant 0 : i32
    %c0_i32_1 = arith.constant 0 : i32
    return %c0_i32, %c0_i32_0 : i32, i32
  }
  func.func @transform_5(%arg0: i32) -> (i32, i32) {
    %c0_i32 = arith.constant 0 : i32
    %c0_i32_0 = arith.constant 0 : i32
    %c0_i32_1 = arith.constant 0 : i32
    return %c0_i32, %c0_i32_0 : i32, i32
  }
  func.func @transform_6(%arg0: i32) -> (i32, i32, i32) {
    %c0_i32 = arith.constant 0 : i32
    %c0_i32_0 = arith.constant 0 : i32
    %c0_i32_1 = arith.constant 0 : i32
    return %arg0, %c0_i32, %c0_i32_0 : i32, i32, i32
  }
}

</mosaic_0001>

<bundles_post_ra>
// kernel: tpu_custom_call.1
= control target key start
LH: loop header
LB: loop body
LE: loop exit
PB: predicated region body
PF: predicated region fallthrough
CT: control target
= control target key end

     0   :  { %11 = vsyncpa [#allocation4], 0  ;;  %s1395_s0 = inlined_call_operand.hbm [shape: f32[2,4,256], index: 0, kind: input, shape index: {}]   ;;  %s1396_s1 = inlined_call_operand.vmem [shape: f32[4,36], index: 1, kind: input, shape index: {}]   ;;  %s1397_s2 = inlined_call_operand.vmem [shape: f32[4,1], index: 2, kind: input, shape index: {}]   ;;  %s1398_s3 = inlined_call_operand.vmem [shape: f32[4,36], index: 3, kind: input, shape index: {}]   ;;  %s1399_s4 = inlined_call_operand.vmem [shape: f32[4,1], index: 4, kind: input, shape index: {}]   ;;  %s1400_s5 = inlined_call_operand.hbm [shape: f32[36,256], index: 5, kind: input, shape index: {}]   ;;  %s1401_s6 = inlined_call_operand.hbm [shape: f32[2,4,256], index: 6, kind: output, shape index: {}]  }
   0x1   :  { %13 = vsyncpa [#allocation4 + $0x1], 0 }
   0x2   :  { %14 = vsyncpa [#allocation7], 0 }
   0x3   :  { %15 = vsyncpa [#allocation5], 0 }
   0x4   :  { %17 = vsyncpa [#allocation5 + $0x1], 0  ;;  %s1076_s21 = smov 0   ;;  %s1078_s22 = smov 0  }
   0x5   :  { %s1080_s23 = smov 0   ;;  %s1082_s24 = smov 0  }
   0x6 LB: > { %s208_s27 = sshll.u32 %s1400_s5, 4  ;;  %s1100_s28 = sadd.s32 4294967295, %s1027_s24   ;;  %s1027_s24 = sphi %s1082_s24, %s1411_s24   ;;  %s1023_s23 = sphi %s1080_s23, %s1410_s23   ;;  %s1019_s22 = sphi %s1078_s22, %s1409_s22   ;;  %s1015_s21 = sphi %s1076_s21, %s1408_s21   ;;  %s209_s27 = int_to_ptr.hbm [resolvable:$true] %s208_s27 }
   0x7   : > { %p802_p0 = scmp.ge.s32.totalorder %s1027_s24, 1  ;;  %p44_p1 = scmp.eq.s32.totalorder %s1100_s28, 0 }
   0x8   : > { %p185_p2 = scmp.lt.s32.totalorder %s1027_s24, 3  ;;  %s1029_s30 = smov [#allocation6]  }
   0x9   : > { %s210_s7 = sshll.u32 %s1029_s30, 4  ;;  %s1030_s8 = smov 256   ;;  %s211_s7 = int_to_ptr.vmem [resolvable:$true] %s210_s7 }
   0xa   : > { %p1105_p3 = pnand %p802_p0, %p185_p2  ;;  %s1031_s9 = smov 16  }
   0xb   : > { %s801_s10 = sadd.s32 4294967294, %s1027_s24   ;;  %s1116_s11 = sadd.s32 1, %s1027_s24  }
   0xc   : > { %p835_p4 = pneg %p1105_p3  ;;  %s30_s12 = sadd.s32 1, %s1023_s23 }
   0xd   : > { %s27_s13 = ssub.s32 %s1027_s24, %s1116_s11  ;;  %p37_p7 = scmp.ne.s32.totalorder %s1023_s23, %s1019_s22 }
   0xe   : > { %p836_p6 = pnand %p835_p4, %p44_p1  ;;  %p28_p8 = scmp.eq.s32.totalorder %s27_s13, 0 }
   0xf   : > { %p38_p9 = scmp.eq.s32.totalorder %s1027_s24, 0  ;;  %p43_p10 = scmp.ne.s32.totalorder %s1019_s22, %s1015_s21 }
  0x10   : > { %838 = dma.hbm_to_vmem [thread:$0]  (!%p836_p6), %s209_s27, 1280, %s211_s7, [#allocation7], %s1030_s8, %s1030_s8, %s1031_s9  }
  0x11   : > { %p172_p11 = scmp.eq.s32.totalorder %s1100_s28, 1  ;;  %p1132_p12 = por %p44_p1, %p43_p10 }
  0x12   : > { %s1128_s14 = scalar_select %p28_p8, %s1023_s23, %s30_s12  }
  0x13   : > { %p1136_p13 = por %p172_p11, %p37_p7  ;;  %p178_p0 = scmp.eq.s32.totalorder %s801_s10, 1 }
  0x14   : > { %p39_p2 = por %p38_p9, %p37_p7  ;;  %s224_s17 = sand.u32 1, %s1023_s23  }
  0x15   : > { %p1141_p4 = por %p178_p0, %p43_p10  ;;  %p848_p6 = scmp.lt.s32.totalorder %s1027_s24, 2 }
  0x16   : > { %s805_s19 = sshll.u32 %s224_s17, 3  ;;  %s825_s20 = sshll.u32 %s1027_s24, 3 }
  0x17   : > { %s233_s27 = scalar_lea.hbm %s1395_s0, %s825_s20  ;;  %s228_s7 = scalar_lea.vmem [#allocation3], %s805_s19 }
  0x18   : > { %s235_s30 = sshll.u32 %s233_s27, 4  ;;  %s237_s8 = sshll.u32 %s228_s7, 4  ;;  %s236_s30 = int_to_ptr.hbm [resolvable:$true] %s235_s30  ;;  %s238_s8 = int_to_ptr.vmem [resolvable:$true] %s237_s8 }
  0x19   : > { %p1150_p8 = pnand %p848_p6, %p39_p2  ;;  %s225_s10 = scalar_lea.sflag [#allocation4], %s224_s17 }
  0x1a   : > { %s927_s12 = sshra.s32 %s236_s30, 4  ;;  %s934_s19 = scalar_lea.hbm %s1395_s0, 16  ;;  %s928_s12 = int_to_ptr.hbm [resolvable:$true] %s927_s12 }
  0x1b   : > { %s929_s13 = scalar_lea.hbm %s928_s12, 8  ;;  %p931_p9 = pneg %p1150_p8 }
  0x1c   : > { %p930_p7 = scmp.ne.s32.totalorder %s928_s12, %s929_s13  ;;  %p935_p0 = scmp.lt.s32.totalorder %s928_s12, %s1395_s0 }
  0x1d   : > { %p936_p2 = scmp.lt.s32.totalorder %s934_s19, %s929_s13 }
  0x1e   : > { %p932_p10 = pnand %p931_p9, %p930_p7 }
  0x1f   : > { %p937_p6 = por %p936_p2, %p935_p0 }
  0x20   : > { %p933_p11 = pneg %p932_p10 }
  0x22   : > { %p938_p5 = pnand %p937_p6, %p933_p11 }
  0x24   : > { %941 = shalt.err (!%p938_p5)
}
  0x25   : > { %842 = dma.hbm_to_vmem [thread:$0]  (!%p1150_p8), %s236_s30, 128, %s238_s8, %s225_s10  }
  0x26   : > { %246 = sbr.rel (%p1105_p3) target bundleno = 703 (0x2bf), region = 44  ;;  %s1167_s17 = sand.u32 (!%p1105_p3), 1, %s1019_s22  }
  0x27   : > { %s809_s7 = sshll.u32 (!%p1105_p3), %s1167_s17, 3  ;;  %s249_s20 = scalar_lea.sflag (!%p1105_p3), [#allocation4], %s1167_s17 }
  0x28   : > { %s252_s12 = scalar_lea.vmem (!%p1105_p3), [#allocation3], %s809_s7 }
  0x2b   : > { %1002 = dma.done.wait (%p1132_p12), %s249_s20, 128  }
  0x2c   : > { %1004 = vsyncadd (%p1132_p12), %s249_s20, 4294967168 }
  0x2d   : > { %1006 = dma.done.wait (%p44_p1), [#allocation7], 1280  }
  0x2e   : > { %1008 = vsyncadd (%p44_p1), [#allocation7], 4294966016  ;;  %v1181_v0 = vld [vmem:[%s252_s12] sm:$0xff]  ;;  %s1032_s29 = smov 16   ;;  %s1033_s15 = smov 15   ;;  %v308_v20 = vlaneseq  ;;  %v1040_v50 = vmov 0  }
  0x2f   : > { %299 = vst [vmem:[#allocation1] ss:$2 sm:$0xff] %v1181_v0  ;;  %s1034_s30 = smov 1   ;;  %s1035_s8 = smov 127   ;;  %v465_v47 = vld [vmem:[%s1397_s2] sm:$0xf]  ;;  %895 = vset.pattern.permute.xlu1 %v1040_v50  ;;  %896 = vset.pattern.permute.xlu0 %v1040_v50 }
  0x30   : > { %s1036_s9 = smov 113   ;;  %s1037_s10 = smov 112   ;;  %v1208_v21 = vand.u32 127, %v308_v20  ;;  %v1253_v63 = vld [vmem:[#allocation6 + $0x40] sm:$0xf]  ;;  %vm475_vm8 = vcmask 1043456  }
  0x31   : > { %s1038_s13 = smov 17   ;;  %s1039_s25 = smov 111   ;;  %vm471_vm9 = vcmask 293888  }
  0x32   : > { %vm324_vm0 = vcmp.lt.s32.totalorder %v1208_v21, 16  ;;  %vm358_vm1 = vcmp.lt.s32.totalorder %v1208_v21, 1  ;;  %vm385_vm2 = vcmp.lt.s32.totalorder %v1208_v21, 127  ;;  %vm405_vm3 = vcmp.lt.s32.totalorder %v1208_v21, 113 }
  0x33   : > { %vm419_vm4 = vcmp.lt.s32.totalorder %v1208_v21, 112  ;;  %vm310_vm5 = vcmp.lt.s32.totalorder %v1208_v21, 17  ;;  %vm439_vm6 = vcmp.lt.s32.totalorder %v1208_v21, 111  ;;  %vm344_vm7 = vcmp.lt.s32.totalorder %v1208_v21, 15  ;;  %v638_v21 = vld [vmem:[%s1398_s3] sm:$0xf] }
  0x36   : > { %v300_v1 = vld.sshfl [vmem:[#allocation1] sm:$0xff pattern:$0x75316420]  ;;  %v301_v2 = vld.sshfl [vmem:[#allocation1 + $0x8] sm:$0xff pattern:$0x75316420] }
  0x37   : > { %315 = vst [vmem:[#allocation1] ss:$2 sm:$0xff] %v1181_v0 }
  0x3e   : > { %v316_v3 = vld.sshfl [vmem:[#allocation1] sm:$0xff pattern:$0x75316420]  ;;  %v317_v4 = vld.sshfl [vmem:[#allocation1 + $0x8] sm:$0xff pattern:$0x75316420] }
  0x3f   : > { %335 = vst [vmem:[#allocation1] ss:$2 sm:$0xff] %v1181_v0  ;;  %320 = vrot.lane.b32.xlu1 %v316_v3, %s1032_s29  ;;  %322 = vrot.lane.b32.xlu2 %v317_v4, %s1032_s29 }
  0x46   : > { %v336_v5 = vld.sshfl [vmem:[#allocation1] sm:$0xff pattern:$0x75316420]  ;;  %v337_v6 = vld.sshfl [vmem:[#allocation1 + $0x8] sm:$0xff pattern:$0x75316420] }
  0x47   : > { %340 = vrot.lane.b32.xlu0 %v336_v5, %s1033_s15  ;;  %349 = vst [vmem:[#allocation1] ss:$2 sm:$0xff] %v1181_v0 }
  0x4e   : > { %v350_v7 = vld.sshfl [vmem:[#allocation1] sm:$0xff pattern:$0x75316420]  ;;  %v351_v8 = vld.sshfl [vmem:[#allocation1 + $0x8] sm:$0xff pattern:$0x75316420] }
  0x4f   : > { %356 = vrot.lane.b32.xlu0 %v351_v8, %s1034_s30  ;;  %369 = vst [vmem:[#allocation1] ss:$2 sm:$0xff] %v1181_v0  ;;  %354 = vrot.lane.b32.xlu2 %v350_v7, %s1034_s30  ;;  %v1260_v7 = vld [vmem:[#allocation6 + $0x38] sm:$0xff] }
  0x56   : > { %v370_v9 = vld.sshfl [vmem:[#allocation1] sm:$0xff pattern:$0x75316420]  ;;  %v371_v10 = vld.sshfl [vmem:[#allocation1 + $0x8] sm:$0xff pattern:$0x75316420] }
  0x57   : > { %376 = vst [vmem:[#allocation1] ss:$2 sm:$0xff] %v1181_v0 }
  0x58   : > { %374 = vst [vmem:[#allocation2 + $0x48] sm:$0xf] %v370_v9 }
  0x59   : > { %375 = vst [vmem:[#allocation2 + $0x28] sm:$0xf] %v371_v10  ;;  %v1263_v10 = vld [vmem:[#allocation6 + $0x20] sm:$0xff] }
  0x5e   : > { %v377_v11 = vld.sshfl [vmem:[#allocation1] sm:$0xff pattern:$0x75316420]  ;;  %v378_v12 = vld.sshfl [vmem:[#allocation1 + $0x8] sm:$0xff pattern:$0x75316420] }
  0x5f   : > { %396 = vst [vmem:[#allocation1] ss:$2 sm:$0xff] %v1181_v0  ;;  %381 = vrot.lane.b32.xlu2 %v377_v11, %s1035_s8 }
  0x66   : > { %v397_v13 = vld.sshfl [vmem:[#allocation1] sm:$0xff pattern:$0x75316420]  ;;  %v398_v14 = vld.sshfl [vmem:[#allocation1 + $0x8] sm:$0xff pattern:$0x75316420] }
  0x67   : > { %401 = vrot.lane.b32.xlu0 %v397_v13, %s1036_s9  ;;  %403 = vrot.lane.b32.xlu1 %v398_v14, %s1036_s9  ;;  %410 = vst [vmem:[#allocation1] ss:$2 sm:$0xff] %v1181_v0  ;;  %v1267_v13 = vld [vmem:[#allocation6 + $0x28] sm:$0xff] }
  0x68   : > { %383 = vrot.lane.b32.xlu2 %v378_v12, %s1035_s8 }
  0x6e   : > { %v411_v15 = vld.sshfl [vmem:[#allocation1] sm:$0xff pattern:$0x75316420]  ;;  %v412_v16 = vld.sshfl [vmem:[#allocation1 + $0x8] sm:$0xff pattern:$0x75316420] }
  0x6f   : > { %415 = vrot.lane.b32.xlu0 %v411_v15, %s1037_s10  ;;  %430 = vst [vmem:[#allocation1] ss:$2 sm:$0xff] %v1181_v0 }
  0x70   : > { %304 = vrot.lane.b32.xlu2 %v300_v1, %s1038_s13  ;;  %v1255_v1 = vld [vmem:[#allocation6 + $0x48] sm:$0xf] }
  0x76   : > { %v431_v17 = vld.sshfl [vmem:[#allocation1] sm:$0xff pattern:$0x75316420]  ;;  %v432_v18 = vld.sshfl [vmem:[#allocation1 + $0x8] sm:$0xff pattern:$0x75316420] }
  0x77   : > { %417 = vrot.lane.b32.xlu0 %v412_v16, %s1037_s10  ;;  %435 = vrot.lane.b32.xlu1 %v431_v17, %s1039_s25  ;;  %v1271_v16 = vld [vmem:[#allocation6 + $0x10] sm:$0xff] }
  0x7f   : > { %306 = vrot.lane.b32.xlu0 %v301_v2, %s1038_s13  ;;  %437 = vrot.lane.b32.xlu1 %v432_v18, %s1039_s25  ;;  %v1257_v2 = vld [vmem:[#allocation6 + $0x30] sm:$0xff]  ;;  %v1274_v18 = vld [vmem:[#allocation6 + $0x18] sm:$0xff] }
  0x87   : > { %342 = vrot.lane.b32.xlu1 %v337_v6, %s1033_s15 }
  0x8f   : > { %468 = vperm.xlu1 %895, %v465_v47  }
  0x99   : > { %v323_v19 = vpop.permute.xlu2 %322 }
  0xa9   : > { %v355_v22 = vpop.permute.xlu2 %354 }
  0xb1   : > { %v321_v23 = vpop.permute.xlu1 %320 }
  0xb2   : > { %v325_v24 = vsel %vm324_vm0, %v321_v23, %v323_v19  ;;  %v326_v25 = vsel %vm324_vm0, %v323_v19, %v321_v23 }
  0xb3   : > { %v329_v26 = vrot.slane %v326_v25, 4  ;;  %v330_v27 = vrot.slane %v325_v24, 4 }
  0xb5   : > { %333 = vst [vmem:[#allocation2 + $0x30] sm:$0xf0] %v329_v26  ;;  %v1280_v26 = vld [vmem:[#allocation6 + $0x8] sm:$0xff] }
  0xb6   : > { %334 = vst [vmem:[#allocation2] sm:$0xf0] %v330_v27 }
  0xb9   : > { %v341_v28 = vpop.permute.xlu0 %340  ;;  %v382_v29 = vpop.permute.xlu2 %381 }
  0xc1   : > { %v357_v30 = vpop.permute.xlu0 %356 }
  0xc2   : > { %v359_v31 = vsel %vm358_vm1, %v355_v22, %v357_v30  ;;  %v360_v32 = vsel %vm358_vm1, %v357_v30, %v355_v22  ;;  %v384_v33 = vpop.permute.xlu2 %383  ;;  %v1277_v22 = vld [vmem:[#allocation6] sm:$0xff]  ;;  %v464_v30 = vld [vmem:[%s1396_s1] sm:$0xf] }
  0xc3   : > { %v363_v34 = vrot.slane %v360_v32, 4  ;;  %v364_v35 = vrot.slane %v359_v31, 4  ;;  %v386_v36 = vsel %vm385_vm2, %v382_v29, %v384_v33  ;;  %v387_v37 = vsel %vm385_vm2, %v384_v33, %v382_v29 }
  0xc4   : > { %v390_v38 = vrot.slane %v386_v36, 4  ;;  %v391_v39 = vrot.slane %v387_v37, 4 }
  0xc5   : > { %367 = vst [vmem:[#allocation2 + $0x18] sm:$0xf0] %v363_v34 }
  0xc6   : > { %368 = vst [vmem:[#allocation2 + $0x10] sm:$0xf0] %v364_v35 }
  0xc7   : > { %394 = vst [vmem:[#allocation2 + $0x48] sm:$0xf0] %v390_v38 }
  0xc8   : > { %395 = vst [vmem:[#allocation2 + $0x28] sm:$0xf0] %v391_v39 }
  0xca   : > { %v305_v53 = vpop.permute.xlu2 %304 }
  0xce   : > { %v448_v11 = vld [vmem:[#allocation2 + $0x48] sm:$0xff] }
  0xcf   : > { %v449_v14 = vld [vmem:[#allocation2 + $0x28] sm:$0xff]  ;;  %v458_v17 = vmul.f32 %v448_v11, %v1263_v10 }
  0xd0   : > { %v459_v19 = vmul.f32 %v449_v14, %v1267_v13 }
  0xd9   : > { %v402_v40 = vpop.permute.xlu0 %401  ;;  %v404_v41 = vpop.permute.xlu1 %403 }
  0xda   : > { %v406_v42 = vsel %vm405_vm3, %v402_v40, %v404_v41  ;;  %v407_v43 = vsel %vm405_vm3, %v404_v41, %v402_v40 }
  0xdb   : > { %408 = vst [vmem:[#allocation2 + $0x8] sm:$0xf] %v406_v42 }
  0xdc   : > { %409 = vst [vmem:[#allocation2 + $0x20] sm:$0xf] %v407_v43 }
  0xe1   : > { %v416_v44 = vpop.permute.xlu0 %415 }
  0xe9   : > { %v418_v45 = vpop.permute.xlu0 %417  ;;  %v436_v46 = vpop.permute.xlu1 %435 }
  0xea   : > { %v420_v48 = vsel %vm419_vm4, %v416_v44, %v418_v45  ;;  %v421_v49 = vsel %vm419_vm4, %v418_v45, %v416_v44 }
  0xeb   : > { %v424_v51 = vrot.slane %v420_v48, 4  ;;  %v425_v52 = vrot.slane %v421_v49, 4 }
  0xed   : > { %428 = vst [vmem:[#allocation2 + $0x8] sm:$0xf0] %v424_v51 }
  0xee   : > { %429 = vst [vmem:[#allocation2 + $0x20] sm:$0xf0] %v425_v52 }
  0xf1   : > { %v307_v54 = vpop.permute.xlu0 %306  ;;  %v438_v55 = vpop.permute.xlu1 %437 }
  0xf2   : > { %v311_v56 = vsel %vm310_vm5, %v305_v53, %v307_v54  ;;  %v312_v57 = vsel %vm310_vm5, %v307_v54, %v305_v53  ;;  %v440_v58 = vsel %vm439_vm6, %v436_v46, %v438_v55  ;;  %v441_v59 = vsel %vm439_vm6, %v438_v55, %v436_v46 }
  0xf3   : > { %313 = vst [vmem:[#allocation2 + $0x30] sm:$0xf] %v312_v57 }
  0xf4   : > { %314 = vst [vmem:[#allocation2] sm:$0xf] %v311_v56  ;;  %v450_v4 = vld [vmem:[#allocation2 + $0x8] sm:$0xff] }
  0xf5   : > { %442 = vst [vmem:[#allocation2 + $0x40] sm:$0xf] %v440_v58  ;;  %v451_v8 = vld [vmem:[#allocation2 + $0x20] sm:$0xff]  ;;  %v460_v12 = vmul.f32 %v450_v4, %v1257_v2 }
  0xf6   : > { %443 = vst [vmem:[#allocation2 + $0x38] sm:$0xf] %v441_v59  ;;  %v461_v15 = vmul.f32 %v451_v8, %v1260_v7 }
  0xf9   : > { %v343_v60 = vpop.permute.xlu1 %342 }
  0xfa   : > { %v345_v61 = vsel %vm344_vm7, %v341_v28, %v343_v60  ;;  %v346_v62 = vsel %vm344_vm7, %v343_v60, %v341_v28  ;;  %v444_v23 = vld [vmem:[#allocation2 + $0x30] sm:$0xff] }
  0xfb   : > { %347 = vst [vmem:[#allocation2 + $0x18] sm:$0xf] %v346_v62  ;;  %v445_v27 = vld [vmem:[#allocation2] sm:$0xff]  ;;  %v454_v29 = vmul.f32 %v444_v23, %v1277_v22 }
  0xfc   : > { %348 = vst [vmem:[#allocation2 + $0x10] sm:$0xf] %v345_v61  ;;  %v452_v3 = vld [vmem:[#allocation2 + $0x40] sm:$0xf]  ;;  %v455_v31 = vmul.f32 %v445_v27, %v1280_v26 }
  0xfd   : > { %v462_v5 = vmul.f32 %v452_v3, %v1253_v63  ;;  %v453_v6 = vld [vmem:[#allocation2 + $0x38] sm:$0xf] }
  0xfe   : > { %v463_v9 = vmul.f32 %v453_v6, %v1255_v1  ;;  %v639_v6 = vld [vmem:[%s1399_s4] sm:$0xf] }
  0xff   : > { %812 = vmatpush.msk.msra.mxu0 %vm475_vm8, %v462_v5 }
 0x100   : > { %814 = vmatpush.msk.msra.mxu1 %vm475_vm8, %v463_v9 }
 0x101   : > { %494 = vmatpush.msra.mxu0 %v460_v12  ;;  %v469_v32 = vpop.permute.xlu1 %468 }
 0x102   : > { %514 = vmatpush.msra.mxu1 %v461_v15  ;;  %v446_v20 = vld [vmem:[#allocation2 + $0x18] sm:$0xff] }
 0x103   : > { %495 = vmatpush.msra.mxu0 %v458_v17  ;;  %v456_v24 = vmul.f32 %v446_v20, %v1271_v16  ;;  %v447_v25 = vld [vmem:[#allocation2 + $0x10] sm:$0xff] }
 0x104   : > { %515 = vmatpush.msra.mxu1 %v459_v19  ;;  %v457_v28 = vmul.f32 %v447_v25, %v1274_v18 }
 0x105   : > { %496 = vmatpush.msra.mxu0 %v456_v24 }
 0x106   : > { %516 = vmatpush.msra.mxu1 %v457_v28 }
 0x107   : > { %497 = vmatpush.msra.mxu0 %v454_v29 }
 0x108   : > { %517 = vmatpush.msra.mxu1 %v455_v31  ;;  %813 = vmatmul.msk.f32.vlgmr.msra.gmra.mxu0 %vm471_vm9, %v464_v30 }
 0x109   : > { %815 = vmatmul.msk.f32.vlgmr.msra.gmra.mxu1 %vm471_vm9, %v464_v30 }
 0x185   : > { %v499_v33 = vpop.f32.mrf.mxu0 }
 0x186   : > { %v519_v34 = vpop.f32.mrf.mxu1  ;;  %v500_v35 = vadd.f32 %v499_v33, %v469_v32 }
 0x187   : > { %v520_v36 = vadd.f32 %v519_v34, %v469_v32 }
 0x188   : > { %vm522_vm10 = vcmp.ge.f32.partialorder %v500_v35, 0.0  ;;  %v524_v37 = vmul.f32 0.2, %v500_v35 }
 0x189   : > { %vm523_vm11 = vcmp.ge.f32.partialorder %v520_v36, 0.0  ;;  %v525_v38 = vmul.f32 0.2, %v520_v36 }
 0x18a   : > { %v526_v39 = vsel %vm522_vm10, %v500_v35, %v524_v37 }
 0x18b   : > { %v527_v40 = vsel %vm523_vm11, %v520_v36, %v525_v38  ;;  %572 = vst [vmem:[#allocation2 + $0x48] sm:$0xf] %v526_v39  ;;  %610 = vrot.lane.b32.xlu1 %v526_v39, %s1039_s25  ;;  %596 = vrot.lane.b32.xlu2 %v526_v39, %s1037_s10 }
 0x18c   : > { %573 = vst [vmem:[#allocation2 + $0x28] sm:$0xf] %v527_v40  ;;  %598 = vrot.lane.b32.xlu0 %v527_v40, %s1037_s10 }
 0x193   : > { %576 = vrot.lane.b32.xlu1 %v527_v40, %s1035_s8  ;;  %612 = vrot.lane.b32.xlu2 %v527_v40, %s1039_s25  ;;  %s286_s25 = scalar_lea.vmem [#allocation8], %s809_s7  ;;  %s977_s7 = scalar_lea.hbm %s1401_s6, 16 }
 0x194   : > { %574 = vrot.lane.b32.xlu0 %v526_v39, %s1035_s8  ;;  %s826_s8 = sshll.u32 %s1100_s28, 3  ;;  %s718_s19 = sshll.u32 %s286_s25, 4  ;;  %s719_s19 = int_to_ptr.vmem [resolvable:$true] %s718_s19 }
 0x195   : > { %s705_s28 = scalar_lea.sflag [#allocation5], %s1167_s17 }
 0x19b   : > { %558 = vrot.lane.b32.xlu1 %v526_v39, %s1034_s30  ;;  %588 = vrot.lane.b32.xlu2 %v526_v39, %s1036_s9 }
 0x19c   : > { %590 = vrot.lane.b32.xlu0 %v527_v40, %s1036_s9 }
 0x1a3   : > { %538 = vrot.lane.b32.xlu1 %v527_v40, %s1032_s29  ;;  %560 = vrot.lane.b32.xlu2 %v527_v40, %s1034_s30 }
 0x1a4   : > { %536 = vrot.lane.b32.xlu0 %v526_v39, %s1032_s29 }
 0x1ab   : > { %528 = vrot.lane.b32.xlu1 %v526_v39, %s1038_s13  ;;  %550 = vrot.lane.b32.xlu2 %v526_v39, %s1033_s15 }
 0x1ac   : > { %552 = vrot.lane.b32.xlu0 %v527_v40, %s1033_s15 }
 0x1b3   : > { %530 = vrot.lane.b32.xlu2 %v527_v40, %s1038_s13  ;;  %s716_s13 = scalar_lea.hbm %s1401_s6, %s826_s8 }
 0x1b4   : > { %642 = vperm.xlu0 %896, %v639_v6   ;;  %s720_s26 = sshll.u32 %s716_s13, 4  ;;  %s721_s26 = int_to_ptr.hbm [resolvable:$true] %s720_s26 }
 0x1b5   : > { %s971_s27 = sshra.s32 %s721_s26, 4  ;;  %s972_s27 = int_to_ptr.hbm [resolvable:$true] %s971_s27 }
 0x1b6   : > { %s973_s20 = scalar_lea.hbm %s972_s27, 8  ;;  %p978_p12 = scmp.lt.s32.totalorder %s972_s27, %s1401_s6 }
 0x1b7   : > { %p974_p1 = scmp.ne.s32.totalorder %s972_s27, %s973_s20  ;;  %p979_p8 = scmp.lt.s32.totalorder %s977_s7, %s973_s20 }
 0x1b9   : > { %p975_p3 = pnand %p974_p1, %p1136_p13  ;;  %p980_p7 = por %p979_p8, %p978_p12 }
 0x1bb   : > { %p976_p5 = pneg %p975_p3 }
 0x1bd   : > { %p981_p9 = pnand %p980_p7, %p976_p5 }
 0x1e5   : > { %v597_v41 = vpop.permute.xlu2 %596 }
 0x1ed   : > { %v613_v42 = vpop.permute.xlu2 %612 }
 0x1f5   : > { %v589_v47 = vpop.permute.xlu2 %588 }
 0x1fd   : > { %v611_v43 = vpop.permute.xlu1 %610  ;;  %v561_v62 = vpop.permute.xlu2 %560 }
 0x1fe   : > { %v599_v44 = vpop.permute.xlu0 %598  ;;  %v614_v45 = vsel %vm439_vm6, %v611_v43, %v613_v42  ;;  %v615_v46 = vsel %vm439_vm6, %v613_v42, %v611_v43 }
 0x1ff   : > { %v600_v48 = vsel %vm419_vm4, %v597_v41, %v599_v44  ;;  %v601_v49 = vsel %vm419_vm4, %v599_v44, %v597_v41  ;;  %616 = vst [vmem:[#allocation2 + $0x40] sm:$0xf] %v614_v45 }
 0x200   : > { %v604_v50 = vrot.slane %v600_v48, 4  ;;  %v605_v51 = vrot.slane %v601_v49, 4  ;;  %617 = vst [vmem:[#allocation2 + $0x38] sm:$0xf] %v615_v46 }
 0x202   : > { %608 = vst [vmem:[#allocation2 + $0x8] sm:$0xf0] %v604_v50 }
 0x203   : > { %609 = vst [vmem:[#allocation2 + $0x20] sm:$0xf0] %v605_v51 }
 0x205   : > { %v577_v52 = vpop.permute.xlu1 %576  ;;  %v551_v12 = vpop.permute.xlu2 %550 }
 0x206   : > { %v575_v53 = vpop.permute.xlu0 %574  ;;  %v626_v54 = vld [vmem:[#allocation2 + $0x40] sm:$0xf] }
 0x207   : > { %v578_v55 = vsel %vm385_vm2, %v575_v53, %v577_v52  ;;  %v579_v56 = vsel %vm385_vm2, %v577_v52, %v575_v53  ;;  %v636_v57 = vmul.f32 %v626_v54, %v1253_v63  ;;  %v627_v58 = vld [vmem:[#allocation2 + $0x38] sm:$0xf] }
 0x208   : > { %v582_v59 = vrot.slane %v578_v55, 4  ;;  %v583_v60 = vrot.slane %v579_v56, 4  ;;  %v637_v61 = vmul.f32 %v627_v58, %v1255_v1 }
 0x209   : > { %816 = vmatpush.msk.msra.mxu2 %vm475_vm8, %v636_v57 }
 0x20a   : > { %586 = vst [vmem:[#allocation2 + $0x48] sm:$0xf0] %v582_v59  ;;  %818 = vmatpush.msk.msra.mxu3 %vm475_vm8, %v637_v61 }
 0x20b   : > { %587 = vst [vmem:[#allocation2 + $0x28] sm:$0xf0] %v583_v60 }
 0x20d   : > { %v559_v3 = vpop.permute.xlu1 %558  ;;  %v531_v33 = vpop.permute.xlu2 %530 }
 0x20e   : > { %v591_v4 = vpop.permute.xlu0 %590  ;;  %v562_v5 = vsel %vm358_vm1, %v559_v3, %v561_v62  ;;  %v563_v63 = vsel %vm358_vm1, %v561_v62, %v559_v3 }
 0x20f   : > { %v592_v1 = vsel %vm405_vm3, %v589_v47, %v591_v4  ;;  %v593_v8 = vsel %vm405_vm3, %v591_v4, %v589_v47  ;;  %v566_v9 = vrot.slane %v563_v63, 4  ;;  %v567_v11 = vrot.slane %v562_v5, 4 }
 0x210   : > { %594 = vst [vmem:[#allocation2 + $0x8] sm:$0xf] %v592_v1 }
 0x211   : > { %595 = vst [vmem:[#allocation2 + $0x20] sm:$0xf] %v593_v8  ;;  %v622_v23 = vld [vmem:[#allocation2 + $0x48] sm:$0xff] }
 0x212   : > { %570 = vst [vmem:[#allocation2 + $0x18] sm:$0xf0] %v566_v9  ;;  %v623_v29 = vld [vmem:[#allocation2 + $0x28] sm:$0xff]  ;;  %v632_v31 = vmul.f32 %v622_v23, %v1263_v10 }
 0x213   : > { %571 = vst [vmem:[#allocation2 + $0x10] sm:$0xf0] %v567_v11  ;;  %v633_v32 = vmul.f32 %v623_v29, %v1267_v13 }
 0x215   : > { %v539_v14 = vpop.permute.xlu1 %538 }
 0x216   : > { %v537_v15 = vpop.permute.xlu0 %536 }
 0x217   : > { %v540_v17 = vsel %vm324_vm0, %v537_v15, %v539_v14  ;;  %v541_v19 = vsel %vm324_vm0, %v539_v14, %v537_v15  ;;  %v624_v20 = vld [vmem:[#allocation2 + $0x8] sm:$0xff] }
 0x218   : > { %v544_v24 = vrot.slane %v541_v19, 4  ;;  %v545_v25 = vrot.slane %v540_v17, 4  ;;  %v634_v27 = vmul.f32 %v624_v20, %v1257_v2  ;;  %v625_v28 = vld [vmem:[#allocation2 + $0x20] sm:$0xff] }
 0x219   : > { %v635_v30 = vmul.f32 %v625_v28, %v1260_v7 }
 0x21a   : > { %548 = vst [vmem:[#allocation2 + $0x30] sm:$0xf0] %v544_v24  ;;  %666 = vmatpush.msra.mxu2 %v634_v27 }
 0x21b   : > { %549 = vst [vmem:[#allocation2] sm:$0xf0] %v545_v25  ;;  %686 = vmatpush.msra.mxu3 %v635_v30 }
 0x21c   : > { %667 = vmatpush.msra.mxu2 %v632_v31 }
 0x21d   : > { %687 = vmatpush.msra.mxu3 %v633_v32  ;;  %v529_v34 = vpop.permute.xlu1 %528 }
 0x21e   : > { %v553_v35 = vpop.permute.xlu0 %552  ;;  %v533_v2 = vsel %vm310_vm5, %v531_v33, %v529_v34  ;;  %v532_v10 = vsel %vm310_vm5, %v529_v34, %v531_v33 }
 0x21f   : > { %v554_v36 = vsel %vm344_vm7, %v551_v12, %v553_v35  ;;  %v555_v7 = vsel %vm344_vm7, %v553_v35, %v551_v12  ;;  %534 = vst [vmem:[#allocation2 + $0x30] sm:$0xf] %v533_v2 }
 0x220   : > { %556 = vst [vmem:[#allocation2 + $0x18] sm:$0xf] %v555_v7 }
 0x221   : > { %557 = vst [vmem:[#allocation2 + $0x10] sm:$0xf] %v554_v36 }
 0x222   : > { %535 = vst [vmem:[#allocation2] sm:$0xf] %v532_v10 }
 0x226   : > { %v618_v37 = vld [vmem:[#allocation2 + $0x30] sm:$0xff] }
 0x227   : > { %v620_v13 = vld [vmem:[#allocation2 + $0x18] sm:$0xff]  ;;  %v628_v42 = vmul.f32 %v618_v37, %v1277_v22 }
 0x228   : > { %v630_v38 = vmul.f32 %v620_v13, %v1271_v16  ;;  %v621_v39 = vld [vmem:[#allocation2 + $0x10] sm:$0xff]  ;;  %v643_v16 = vpop.permute.xlu0 %642 }
 0x229   : > { %v631_v40 = vmul.f32 %v621_v39, %v1274_v18  ;;  %v619_v41 = vld [vmem:[#allocation2] sm:$0xff] }
 0x22a   : > { %668 = vmatpush.msra.mxu2 %v630_v38  ;;  %v629_v43 = vmul.f32 %v619_v41, %v1280_v26 }
 0x22b   : > { %688 = vmatpush.msra.mxu3 %v631_v40 }
 0x22c   : > { %669 = vmatpush.msra.mxu2 %v628_v42 }
 0x22d   : > { %689 = vmatpush.msra.mxu3 %v629_v43  ;;  %817 = vmatmul.msk.f32.vlgmr.msra.gmra.mxu2 %vm471_vm9, %v638_v21 }
 0x22e   : > { %819 = vmatmul.msk.f32.vlgmr.msra.gmra.mxu3 %vm471_vm9, %v638_v21 }
 0x2b0   : > { %v671_v18 = vpop.f32.mrf.mxu2 }
 0x2b1   : > { %v691_v44 = vpop.f32.mrf.mxu3  ;;  %v672_v45 = vadd.f32 %v671_v18, %v643_v16 }
 0x2b2   : > { %v692_v22 = vadd.f32 %v691_v44, %v643_v16 }
 0x2b4   : > { %v696_v46 = vrot.slane %v692_v22, 4 }
 0x2b6   : > { %v697_v26 = vsel %vm475_vm8, %v672_v45, %v696_v46 }
 0x2b7   : > { %v699_v47 = vadd.f32 %v697_v26, %v1181_v0 }
 0x2b9   : > { %v701_v48 = vmul.f32 0.2, %v699_v47  ;;  %vm700_vm12 = vcmp.ge.f32.partialorder %v699_v47, 0.0 }
 0x2bb   : > { %v702_v49 = vsel %vm700_vm12, %v699_v47, %v701_v48 }
 0x2bc   : > { %703 = vst [vmem:[%s286_s25] sm:$0xff] %v702_v49 }
 0x2bd   : > { %984 = shalt.err (!%p981_p9)
}
 0x2be   : > { %833 = dma.vmem_to_hbm [thread:$0]  (%p1136_p13), %s719_s19, 128, %s721_s26, %s705_s28  }
 0x2bf PF: > { %s732_s17 = sand.u32 1, %s1015_s21   ;;  %p1407_p10 = scmp.ge.s32.totalorder %s1027_s24, 2 }
 0x2c0   : > { %s733_s8 = scalar_lea.sflag [#allocation5], %s732_s17 }
 0x2c1   : > { %p844_p11 = pnand %p1407_p10, %p1141_p4 }
 0x2c3   : > { %p845_p0 = pneg %p844_p11 }
 0x2c5   : > { %1010 = dma.done.wait (%p845_p0), %s733_s8, 128  }
 0x2c6   : > { %1012 = vsyncadd (%p845_p0), %s733_s8, 4294967168  ;;  %p20_p2 = scmp.ge.s32.totalorder %s1116_s11, 4   ;;  %s1408_s21 = smov %s1019_s22 }
 0x2c7   : > { %s1409_s22 = smov %s1023_s23  ;;  %s1410_s23 = smov %s1128_s14 }
 0x2c8   : > { %s1411_s24 = smov %s1116_s11  ;;  %22 = sbr.rel (!%p20_p2) target bundleno = 6 (0x6), region = 93 }
 0x2cd   :  { %739 = vsyncpa [#allocation4], 1 }
 0x2ce   :  { %741 = vsyncpa [#allocation4 + $0x1], 1 }
 0x2cf   :  { %742 = vsyncpa [#allocation7], 1 }
 0x2d0   :  { %743 = vsyncpa [#allocation5], 1 }
 0x2d1   :  { %745 = vsyncpa [#allocation5 + $0x1], 1 }

</bundles_post_ra>
